<compile_context>
chip_gen: v7x
topology: tpu7x:2x2x1
jax: 0.10.0
libtpu: 0.0.40
codegen_flags: <defaults>
</compile_context>

<pallas_src>
from functools import partial

import jax
import jax.numpy as jnp
from jax import lax
from jax.experimental import pallas as pl
from jax.experimental.pallas import tpu as pltpu


# ---------------------------------------------------------------------------
# Generation-aware budgets & tiling helpers
# ---------------------------------------------------------------------------

def _tpu_budget():
    """(vmem_limit_bytes, tm_target, tq_target, tkv_target) per TPU generation."""
    cap = 0
    try:
        cap = int(getattr(pltpu.get_tpu_info(), "vmem_capacity_bytes", 0))
    except Exception:
        cap = 0
    if cap >= 96 * 1024 * 1024:
        # v5e / v6e: 128 MiB physical VMEM -> large tiles, generous limit.
        return 100 * 1024 * 1024, 512, 512, 1024
    # v7x (64 MiB per TensorCore) or unknown: leave headroom for compiler
    # internal scratch and the double-buffered pipeline.
    return 48 * 1024 * 1024, 256, 256, 512


def _sublane_align(dtype):
    """Minimum second-to-last tile dim for a dtype (8 f32, 16 bf16, 32 int8)."""
    return max(8, 32 // jnp.dtype(dtype).itemsize)


def _pick_tile(dim, target, align):
    """Largest tile <= target that divides `dim` and is a multiple of `align`;
    falls back to the full dim (block == full array extent is always legal)."""
    if dim <= target:
        return dim
    t = (target // align) * align
    while t >= align:
        if dim % t == 0:
            return t
        t -= align
    return dim


def _const_spec(block_shape, index_map):
    """BlockSpec for blocks whose index_map is constant over the whole grid:
    request a single buffer so resident weights/biases are not double-buffered."""
    try:
        return pl.BlockSpec(block_shape, index_map, pipeline_mode=pl.Buffered(1))
    except TypeError:  # older BlockSpec signature without pipeline_mode
        return pl.BlockSpec(block_shape, index_map)


# ---------------------------------------------------------------------------
# Fused modality projection + Q projection   (audio path)
#   a = x @ Wa + ba ;  q = a @ Wq + bq       -> outputs (a, q)
#   (Wq/bq arrive pre-scaled by 1/sqrt(head_dim))
# ---------------------------------------------------------------------------

def _fused_proj_q_kernel(x_ref, wa_ref, ba_ref, wq_ref, bq_ref,
                         a_ref, q_ref, acc_ref):
    k = pl.program_id(1)

    @pl.when(k == 0)
    def _():
        acc_ref[...] = jnp.zeros_like(acc_ref)

    acc_ref[...] += jnp.dot(x_ref[...], wa_ref[...],
                            preferred_element_type=jnp.float32)

    @pl.when(k == pl.num_programs(1) - 1)
    def _():
        a = acc_ref[...] + ba_ref[...]
        a_ref[...] = a.astype(a_ref.dtype)
        q = jnp.dot(a.astype(wq_ref.dtype), wq_ref[...],
                    preferred_element_type=jnp.float32) + bq_ref[...]
        q_ref[...] = q.astype(q_ref.dtype)


def fused_proj_q(x2d, wa, ba, wq, bq, *, tm_target, vmem_limit, tk_target=512):
    M, Din = x2d.shape
    hidden = wa.shape[1]
    tm = _pick_tile(M, tm_target, _sublane_align(x2d.dtype))
    tk = _pick_tile(Din, tk_target, 128)
    grid = (M // tm, Din // tk)
    isz = jnp.dtype(x2d.dtype).itemsize
    cost = pl.CostEstimate(
        flops=int(2 * M * Din * hidden + 2 * M * hidden * hidden),
        transcendentals=0,
        bytes_accessed=int(isz * (M * Din + Din * hidden + hidden * hidden
                                  + 2 * hidden + 2 * M * hidden)))
    return pl.pallas_call(
        _fused_proj_q_kernel,
        out_shape=(jax.ShapeDtypeStruct((M, hidden), x2d.dtype),
                   jax.ShapeDtypeStruct((M, hidden), x2d.dtype)),
        grid_spec=pltpu.PrefetchScalarGridSpec(
            num_scalar_prefetch=0,
            grid=grid,
            in_specs=[
                pl.BlockSpec((tm, tk), lambda i, k: (i, k)),
                pl.BlockSpec((tk, hidden), lambda i, k: (k, 0)),
                _const_spec((1, hidden), lambda i, k: (0, 0)),
                _const_spec((hidden, hidden), lambda i, k: (0, 0)),
                _const_spec((1, hidden), lambda i, k: (0, 0)),
            ],
            out_specs=[
                pl.BlockSpec((tm, hidden), lambda i, k: (i, 0)),
                pl.BlockSpec((tm, hidden), lambda i, k: (i, 0)),
            ],
            scratch_shapes=[pltpu.VMEM((tm, hidden), jnp.float32)],
        ),
        compiler_params=pltpu.CompilerParams(
            dimension_semantics=("parallel", "arbitrary"),
            vmem_limit_bytes=vmem_limit),
        cost_estimate=cost,
    )(x2d, wa, ba.reshape(1, hidden), wq, bq.reshape(1, hidden))


# ---------------------------------------------------------------------------
# Fused modality projection + packed K/V projection   (video path)
#   vid = x @ Wp + bp ;  kv = vid @ [Wk|Wv] + [bk|bv]
# ---------------------------------------------------------------------------

def _fused_proj_kv_kernel(x_ref, wp_ref, bp_ref, wkv_ref, bkv_ref,
                          kv_ref, acc_ref):
    k = pl.program_id(1)

    @pl.when(k == 0)
    def _():
        acc_ref[...] = jnp.zeros_like(acc_ref)

    acc_ref[...] += jnp.dot(x_ref[...], wp_ref[...],
                            preferred_element_type=jnp.float32)

    @pl.when(k == pl.num_programs(1) - 1)
    def _():
        vid = acc_ref[...] + bp_ref[...]
        kv = jnp.dot(vid.astype(wkv_ref.dtype), wkv_ref[...],
                     preferred_element_type=jnp.float32) + bkv_ref[...]
        kv_ref[...] = kv.astype(kv_ref.dtype)


def fused_proj_kv(x2d, wp, bp, wkv, bkv, *, tm_target, vmem_limit,
                  tk_target=512):
    M, Din = x2d.shape
    hidden = wp.shape[1]
    two_h = wkv.shape[1]
    tm = _pick_tile(M, tm_target, _sublane_align(x2d.dtype))
    tk = _pick_tile(Din, tk_target, 128)
    grid = (M // tm, Din // tk)
    isz = jnp.dtype(x2d.dtype).itemsize
    cost = pl.CostEstimate(
        flops=int(2 * M * Din * hidden + 2 * M * hidden * two_h),
        transcendentals=0,
        bytes_accessed=int(isz * (M * Din + Din * hidden + hidden * two_h
                                  + hidden + two_h + M * two_h)))
    return pl.pallas_call(
        _fused_proj_kv_kernel,
        out_shape=jax.ShapeDtypeStruct((M, two_h), x2d.dtype),
        grid_spec=pltpu.PrefetchScalarGridSpec(
            num_scalar_prefetch=0,
            grid=grid,
            in_specs=[
                pl.BlockSpec((tm, tk), lambda i, k: (i, k)),
                pl.BlockSpec((tk, hidden), lambda i, k: (k, 0)),
                _const_spec((1, hidden), lambda i, k: (0, 0)),
                _const_spec((hidden, two_h), lambda i, k: (0, 0)),
                _const_spec((1, two_h), lambda i, k: (0, 0)),
            ],
            out_specs=pl.BlockSpec((tm, two_h), lambda i, k: (i, 0)),
            scratch_shapes=[pltpu.VMEM((tm, hidden), jnp.float32)],
        ),
        compiler_params=pltpu.CompilerParams(
            dimension_semantics=("parallel", "arbitrary"),
            vmem_limit_bytes=vmem_limit),
        cost_estimate=cost,
    )(x2d, wp, bp.reshape(1, hidden), wkv, bkv.reshape(1, two_h))


# ---------------------------------------------------------------------------
# Multi-head attention core: flash-style online softmax, KV axis tiled.
# All heads per (batch, q-tile, kv-tile) grid step, lane-dense [tq, hidden]
# output accumulated in a single f32 VMEM scratch (no head transposes, no
# concat of live head outputs).
# ---------------------------------------------------------------------------

def _mha_flash_kernel(q_ref, kv_ref, o_ref, m_sc, l_sc, acc_sc, *,
                      num_heads, head_dim, hidden):
    j = pl.program_id(2)

    @pl.when(j == 0)
    def _():
        m_sc[...] = jnp.full_like(m_sc, -jnp.inf)
        l_sc[...] = jnp.zeros_like(l_sc)
        acc_sc[...] = jnp.zeros_like(acc_sc)

    q = q_ref[0]     # [tq, hidden]     (1/sqrt(head_dim) folded into Wq)
    kv = kv_ref[0]   # [tkv, 2*hidden]  (first half = K, second half = V)

    # TODO(synk): when head_dim % 128 != 0 at production sizes, emit Q/KV from
    # the projection kernels in head-major layout (or add a head grid axis) so
    # the per-head slices below are lane-contiguous and avoid XLU relayouts.
    for h in range(num_heads):                       # static unroll over heads
        lo = h * head_dim
        qh = q[:, lo:lo + head_dim]
        kh = kv[:, lo:lo + head_dim]
        vh = kv[:, hidden + lo:hidden + lo + head_dim]
        # contract last dims of both operands -> no explicit k.T relayout
        s = lax.dot_general(qh, kh,
                            dimension_numbers=(((1,), (1,)), ((), ())),
                            preferred_element_type=jnp.float32)   # [tq, tkv]
        m_prev = m_sc[h]                                           # [tq, 1]
        m_new = jnp.maximum(m_prev, jnp.max(s, axis=-1, keepdims=True))
        alpha = jnp.exp(m_prev - m_new)                            # [tq, 1]
        p = jnp.exp(s - m_new)                                     # [tq, tkv]
        l_sc[h] = alpha * l_sc[h] + jnp.sum(p, axis=-1, keepdims=True)
        pv = jnp.dot(p.astype(vh.dtype), vh,
                     preferred_element_type=jnp.float32)           # [tq, Dh]
        # normalization deferred to finalize (post-PV -> [tq, Dh] VALU work)
        acc_sc[:, lo:lo + head_dim] = alpha * acc_sc[:, lo:lo + head_dim] + pv
        m_sc[h] = m_new

    @pl.when(j == pl.num_programs(2) - 1)
    def _():
        # Per-head post-PV normalization written back into the scratch (only
        # one head's tile live at a time), then one lane-dense [tq, hidden]
        # store.  Reciprocal goes to the EUP slot.
        for h in range(num_heads):
            lo = h * head_dim
            acc_sc[:, lo:lo + head_dim] = (
                acc_sc[:, lo:lo + head_dim]
                * pl.reciprocal(l_sc[h], approx=True))
        o_ref[0] = acc_sc[...].astype(o_ref.dtype)


def mha_core(q, kv, *, num_heads, tq_target, tkv_target, vmem_limit):
    B, Sq, hidden = q.shape
    _, Skv, two_h = kv.shape
    head_dim = hidden // num_heads
    q_align = _sublane_align(q.dtype)
    tq = _pick_tile(Sq, tq_target, q_align)
    # v7x megacore: if B == 1, keep >= 2 blocks along a parallel axis so both
    # TensorCores get work.
    if B == 1 and Sq // tq < 2:
        smaller = _pick_tile(Sq, max(q_align, Sq // 2), q_align)
        if smaller < tq and Sq % smaller == 0:
            tq = smaller
    tkv = _pick_tile(Skv, tkv_target, _sublane_align(kv.dtype))
    grid = (B, Sq // tq, Skv // tkv)
    isz = jnp.dtype(q.dtype).itemsize
    cost = pl.CostEstimate(
        flops=int(4 * B * Sq * Skv * hidden),
        transcendentals=int(2 * B * num_heads * Sq * Skv),
        bytes_accessed=int(isz * (B * Sq * hidden + B * Skv * two_h
                                  + B * Sq * hidden)))
    return pl.pallas_call(
        partial(_mha_flash_kernel, num_heads=num_heads, head_dim=head_dim,
                hidden=hidden),
        out_shape=jax.ShapeDtypeStruct((B, Sq, hidden), q.dtype),
        grid_spec=pltpu.PrefetchScalarGridSpec(
            num_scalar_prefetch=0,
            grid=grid,
            in_specs=[
                pl.BlockSpec((1, tq, hidden), lambda b, i, j: (b, i, 0)),
                pl.BlockSpec((1, tkv, two_h), lambda b, i, j: (b, j, 0)),
            ],
            out_specs=pl.BlockSpec((1, tq, hidden), lambda b, i, j: (b, i, 0)),
            scratch_shapes=[
                pltpu.VMEM((num_heads, tq, 1), jnp.float32),  # running max
                pltpu.VMEM((num_heads, tq, 1), jnp.float32),  # running denom
                pltpu.VMEM((tq, hidden), jnp.float32),        # output accum
            ],
        ),
        compiler_params=pltpu.CompilerParams(
            dimension_semantics=("parallel", "parallel", "arbitrary"),
            vmem_limit_bytes=vmem_limit),
        cost_estimate=cost,
    )(q, kv)


# ---------------------------------------------------------------------------
# Output projection fused with the residual add:  out = x @ Wo + bo + residual
# ---------------------------------------------------------------------------

def _outproj_residual_kernel(x_ref, w_ref, b_ref, r_ref, o_ref, acc_ref):
    k = pl.program_id(1)

    @pl.when(k == 0)
    def _():
        acc_ref[...] = jnp.zeros_like(acc_ref)

    acc_ref[...] += jnp.dot(x_ref[...], w_ref[...],
                            preferred_element_type=jnp.float32)

    @pl.when(k == pl.num_programs(1) - 1)
    def _():
        o_ref[...] = (acc_ref[...] + b_ref[...] + r_ref[...]).astype(o_ref.dtype)


def outproj_residual(x2d, w, b, res2d, *, tm_target, vmem_limit, tk_target=512):
    M, K = x2d.shape
    Dout = w.shape[1]
    tm = _pick_tile(M, tm_target, _sublane_align(x2d.dtype))
    tk = _pick_tile(K, tk_target, 128)
    grid = (M // tm, K // tk)
    isz = jnp.dtype(x2d.dtype).itemsize
    cost = pl.CostEstimate(
        flops=int(2 * M * K * Dout),
        transcendentals=0,
        bytes_accessed=int(isz * (M * K + K * Dout + Dout + 2 * M * Dout)))
    return pl.pallas_call(
        _outproj_residual_kernel,
        out_shape=jax.ShapeDtypeStruct((M, Dout), x2d.dtype),
        grid_spec=pltpu.PrefetchScalarGridSpec(
            num_scalar_prefetch=0,
            grid=grid,
            in_specs=[
                pl.BlockSpec((tm, tk), lambda i, k: (i, k)),
                pl.BlockSpec((tk, Dout), lambda i, k: (k, 0)),
                _const_spec((1, Dout), lambda i, k: (0, 0)),
                pl.BlockSpec((tm, Dout), lambda i, k: (i, 0)),
            ],
            out_specs=pl.BlockSpec((tm, Dout), lambda i, k: (i, 0)),
            scratch_shapes=[pltpu.VMEM((tm, Dout), jnp.float32)],
        ),
        compiler_params=pltpu.CompilerParams(
            dimension_semantics=("parallel", "arbitrary"),
            vmem_limit_bytes=vmem_limit),
        cost_estimate=cost,
    )(x2d, w, b.reshape(1, Dout), res2d)


# ---------------------------------------------------------------------------
# CrossModalAttention forward
# ---------------------------------------------------------------------------

def cross_modal_attention(params, audio_feats, video_feats, num_heads=4):
    B, Sq, Da = audio_feats.shape
    _, Skv, Dv = video_feats.shape
    hidden = params["audio_w"].shape[1]
    head_dim = hidden // num_heads
    scale = 1.0 / (head_dim ** 0.5)

    vmem_limit, tm_t, tq_t, tkv_t = _tpu_budget()

    # Fold the attention scale into the Q projection (free at runtime; in a
    # real deployment this and the K/V weight packing would be precomputed).
    wq = params["wq"] * scale
    bq = params["bq"] * scale
    wkv = jnp.concatenate([params["wk"], params["wv"]], axis=1)   # [h, 2h]
    bkv = jnp.concatenate([params["bk"], params["bv"]], axis=0)   # [2h]

    # Fused modality projection + in-projections (no intermediate HBM round
    # trip for audio_proj / video_proj).
    a2d, q2d = fused_proj_q(audio_feats.reshape(B * Sq, Da),
                            params["audio_w"], params["audio_b"], wq, bq,
                            tm_target=tm_t, vmem_limit=vmem_limit)
    kv2d = fused_proj_kv(video_feats.reshape(B * Skv, Dv),
                         params["video_w"], params["video_b"], wkv, bkv,
                         tm_target=tm_t, vmem_limit=vmem_limit)

    q = q2d.reshape(B, Sq, hidden)          # metadata-only reshape
    kv = kv2d.reshape(B, Skv, 2 * hidden)   # metadata-only reshape

    # Flash-style attention; output stays in [B, Sq, hidden] layout (no head
    # transposes, no concat-heads relayout in XLA).
    attn = mha_core(q, kv, num_heads=num_heads, tq_target=tq_t,
                    tkv_target=tkv_t, vmem_limit=vmem_limit)

    # Output projection fused with the residual add (attn_output + audio_proj).
    fused = outproj_residual(attn.reshape(B * Sq, hidden),
                             params["wo"], params["bo"], a2d,
                             tm_target=tm_t, vmem_limit=vmem_limit)
    return fused.reshape(B, Sq, hidden)


# ---------------------------------------------------------------------------
# Pure-JAX reference (for correctness check)
# ---------------------------------------------------------------------------

def reference(params, audio_feats, video_feats, num_heads=4):
    B, Sq, _ = audio_feats.shape
    _, Skv, _ = video_feats.shape
    hidden = params["audio_w"].shape[1]
    H = num_heads
    Dh = hidden // H

    a = audio_feats @ params["audio_w"] + params["audio_b"]
    vid = video_feats @ params["video_w"] + params["video_b"]

    q = (a @ params["wq"] + params["bq"]).reshape(B, Sq, H, Dh).transpose(0, 2, 1, 3)
    k = (vid @ params["wk"] + params["bk"]).reshape(B, Skv, H, Dh).transpose(0, 2, 1, 3)
    v = (vid @ params["wv"] + params["bv"]).reshape(B, Skv, H, Dh).transpose(0, 2, 1, 3)

    s = jnp.einsum("bhqd,bhkd->bhqk", q, k) / (Dh ** 0.5)
    p = jax.nn.softmax(s, axis=-1)
    o = jnp.einsum("bhqk,bhkd->bhqd", p, v)
    o = o.transpose(0, 2, 1, 3).reshape(B, Sq, hidden)
    return o @ params["wo"] + params["bo"] + a


# ---------------------------------------------------------------------------
# Deterministic parameter init (weights stored as [in, out])
# ---------------------------------------------------------------------------

def init_params(key, audio_dim, video_dim, hidden):
    ks = jax.random.split(key, 10)

    def w(k, shape, scale=0.05):
        return jax.random.normal(k, shape, jnp.float32) * scale

    return {
        "audio_w": w(ks[0], (audio_dim, hidden)),
        "audio_b": w(ks[1], (hidden,)),
        "video_w": w(ks[2], (video_dim, hidden)),
        "video_b": w(ks[3], (hidden,)),
        "wq": w(ks[4], (hidden, hidden)),
        "bq": w(ks[5], (hidden,)),
        "wk": w(ks[6], (hidden, hidden)),
        "bk": w(ks[7], (hidden,)),
        "wv": w(ks[8], (hidden, hidden)),
        "bv": w(ks[9], (hidden,)),
        "wo": w(jax.random.fold_in(key, 100), (hidden, hidden)),
        "bo": w(jax.random.fold_in(key, 101), (hidden,)),
    }


if __name__ == "__main__":
    B, Sq, Skv = 2, 8, 8
    audio_dim, video_dim, hidden = 16, 24, 32
    num_heads = 4

    key = jax.random.PRNGKey(0)
    k_a, k_v, k_p = jax.random.split(key, 3)

    audio_feats = jax.random.normal(k_a, (B, Sq, audio_dim), jnp.float32)
    video_feats = jax.random.normal(k_v, (B, Skv, video_dim), jnp.float32)
    params = init_params(k_p, audio_dim, video_dim, hidden)

    out = cross_modal_attention(params, audio_feats, video_feats, num_heads)
    out = jax.block_until_ready(out)

    ref = reference(params, audio_feats, video_feats, num_heads)
    assert out.shape == (B, Sq, hidden)
    # tolerance slightly relaxed vs exact: softmax denominator uses the EUP
    # approximate reciprocal (pl.reciprocal(..., approx=True))
    assert jnp.allclose(out, ref, atol=5e-3, rtol=5e-3), "mismatch vs reference"

    print("KERNEL_OK")
</pallas_src>

<mosaic_0001>
module attributes {stable_mosaic.version = 11 : i64} {
  func.func @_fused_proj_q_kernel(%arg0: i32, %arg1: i32, %arg2: memref<16x16xf32, #tpu.memory_space<vmem>>, %arg3: memref<16x32xf32, #tpu.memory_space<vmem>>, %arg4: memref<1x32xf32, #tpu.memory_space<vmem>>, %arg5: memref<32x32xf32, #tpu.memory_space<vmem>>, %arg6: memref<1x32xf32, #tpu.memory_space<vmem>>, %arg7: memref<16x32xf32, #tpu.memory_space<vmem>>, %arg8: memref<16x32xf32, #tpu.memory_space<vmem>>, %arg9: memref<16x32xf32, #tpu.memory_space<vmem>>) attributes {dimension_semantics = [#tpu.dimension_semantics<parallel>, #tpu.dimension_semantics<arbitrary>], iteration_bounds = array<i64: 1, 1>, scalar_prefetch = 0 : i64, scratch_operands = 1 : i64, tpu.core_type = #tpu.core_type<tc>, window_params = [{transform_indices = @transform_0, window_bounds = array<i64: 16, 16>}, {transform_indices = @transform_1, window_bounds = array<i64: 16, 32>}, {pipeline_mode = #tpu.pipeline_mode<synchronous>, transform_indices = @transform_2, window_bounds = array<i64: 1, 32>}, {pipeline_mode = #tpu.pipeline_mode<synchronous>, transform_indices = @transform_3, window_bounds = array<i64: 32, 32>}, {pipeline_mode = #tpu.pipeline_mode<synchronous>, transform_indices = @transform_4, window_bounds = array<i64: 1, 32>}, {transform_indices = @transform_5, window_bounds = array<i64: 16, 32>}, {transform_indices = @transform_6, window_bounds = array<i64: 16, 32>}]} {
    %c0_i32 = arith.constant 0 : i32
    %0 = arith.cmpi eq, %arg1, %c0_i32 : i32
    %1 = arith.extui %0 : i1 to i32
    %c0_i32_0 = arith.constant 0 : i32
    %2 = arith.cmpi ne, %1, %c0_i32_0 : i32
    scf.if %2 {
      %cst_10 = arith.constant 0.000000e+00 : f32
      %12 = vector.broadcast %cst_10 : f32 to vector<16x32xf32>
      %c0_11 = arith.constant 0 : index
      %c0_12 = arith.constant 0 : index
      %13 = vector.load %arg9[%c0_11, %c0_12] : memref<16x32xf32, #tpu.memory_space<vmem>>, vector<16x32xf32>
      tpu.vector_store %arg9[%c0_11, %c0_12], %12 {strides = array<i32>} : memref<16x32xf32, #tpu.memory_space<vmem>>, vector<16x32xf32>,
    } else {
    }
    %c0 = arith.constant 0 : index
    %c0_1 = arith.constant 0 : index
    %3 = vector.load %arg9[%c0, %c0_1] : memref<16x32xf32, #tpu.memory_space<vmem>>, vector<16x32xf32>
    %c0_2 = arith.constant 0 : index
    %c0_3 = arith.constant 0 : index
    %4 = vector.load %arg2[%c0_2, %c0_3] : memref<16x16xf32, #tpu.memory_space<vmem>>, vector<16x16xf32>
    %c0_4 = arith.constant 0 : index
    %c0_5 = arith.constant 0 : index
    %5 = vector.load %arg3[%c0_4, %c0_5] : memref<16x32xf32, #tpu.memory_space<vmem>>, vector<16x32xf32>
    %cst = arith.constant dense<0.000000e+00> : vector<16x32xf32>
    %6 = tpu.matmul %4, %5, %cst {dimension_numbers = #tpu.dot_dimension_numbers<[1], [0], [0], [1], [0, 0, 1, 1], [], []>} : vector<16x16xf32>, vector<16x32xf32>, vector<16x32xf32> -> vector<16x32xf32>
    %7 = arith.addf %3, %6 : vector<16x32xf32>
    %c0_6 = arith.constant 0 : index
    %c0_7 = arith.constant 0 : index
    %8 = vector.load %arg9[%c0_6, %c0_7] : memref<16x32xf32, #tpu.memory_space<vmem>>, vector<16x32xf32>
    tpu.vector_store %arg9[%c0_6, %c0_7], %7 {strides = array<i32>} : memref<16x32xf32, #tpu.memory_space<vmem>>, vector<16x32xf32>,
    %c0_i32_8 = arith.constant 0 : i32
    %9 = arith.cmpi eq, %arg1, %c0_i32_8 : i32
    %10 = arith.extui %9 : i1 to i32
    %c0_i32_9 = arith.constant 0 : i32
    %11 = arith.cmpi ne, %10, %c0_i32_9 : i32
    scf.if %11 {
      %c0_10 = arith.constant 0 : index
      %c0_11 = arith.constant 0 : index
      %12 = vector.load %arg9[%c0_10, %c0_11] : memref<16x32xf32, #tpu.memory_space<vmem>>, vector<16x32xf32>
      %c0_12 = arith.constant 0 : index
      %c0_13 = arith.constant 0 : index
      %13 = vector.load %arg4[%c0_12, %c0_13] : memref<1x32xf32, #tpu.memory_space<vmem>>, vector<1x32xf32>
      %14 = vector.broadcast %13 : vector<1x32xf32> to vector<16x32xf32>
      %15 = arith.addf %12, %14 : vector<16x32xf32>
      %c0_14 = arith.constant 0 : index
      %c0_15 = arith.constant 0 : index
      %16 = vector.load %arg7[%c0_14, %c0_15] : memref<16x32xf32, #tpu.memory_space<vmem>>, vector<16x32xf32>
      tpu.vector_store %arg7[%c0_14, %c0_15], %15 {strides = array<i32>} : memref<16x32xf32, #tpu.memory_space<vmem>>, vector<16x32xf32>,
      %c0_16 = arith.constant 0 : index
      %c0_17 = arith.constant 0 : index
      %17 = vector.load %arg5[%c0_16, %c0_17] : memref<32x32xf32, #tpu.memory_space<vmem>>, vector<32x32xf32>
      %cst_18 = arith.constant dense<0.000000e+00> : vector<16x32xf32>
      %18 = tpu.matmul %15, %17, %cst_18 {dimension_numbers = #tpu.dot_dimension_numbers<[1], [0], [0], [1], [0, 0, 1, 1], [], []>} : vector<16x32xf32>, vector<32x32xf32>, vector<16x32xf32> -> vector<16x32xf32>
      %c0_19 = arith.constant 0 : index
      %c0_20 = arith.constant 0 : index
      %19 = vector.load %arg6[%c0_19, %c0_20] : memref<1x32xf32, #tpu.memory_space<vmem>>, vector<1x32xf32>
      %20 = vector.broadcast %19 : vector<1x32xf32> to vector<16x32xf32>
      %21 = arith.addf %18, %20 : vector<16x32xf32>
      %c0_21 = arith.constant 0 : index
      %c0_22 = arith.constant 0 : index
      %22 = vector.load %arg8[%c0_21, %c0_22] : memref<16x32xf32, #tpu.memory_space<vmem>>, vector<16x32xf32>
      tpu.vector_store %arg8[%c0_21, %c0_22], %21 {strides = array<i32>} : memref<16x32xf32, #tpu.memory_space<vmem>>, vector<16x32xf32>,
    } else {
    }
    return
  }
  func.func @transform_0(%arg0: i32, %arg1: i32) -> (i32, i32) {
    %c0_i32 = arith.constant 0 : i32
    return %arg0, %arg1 : i32, i32
  }
  func.func @transform_1(%arg0: i32, %arg1: i32) -> (i32, i32) {
    %c0_i32 = arith.constant 0 : i32
    %c0_i32_0 = arith.constant 0 : i32
    return %arg1, %c0_i32 : i32, i32
  }
  func.func @transform_2(%arg0: i32, %arg1: i32) -> (i32, i32) {
    %c0_i32 = arith.constant 0 : i32
    %c0_i32_0 = arith.constant 0 : i32
    %c0_i32_1 = arith.constant 0 : i32
    return %c0_i32, %c0_i32_0 : i32, i32
  }
  func.func @transform_3(%arg0: i32, %arg1: i32) -> (i32, i32) {
    %c0_i32 = arith.constant 0 : i32
    %c0_i32_0 = arith.constant 0 : i32
    %c0_i32_1 = arith.constant 0 : i32
    return %c0_i32, %c0_i32_0 : i32, i32
  }
  func.func @transform_4(%arg0: i32, %arg1: i32) -> (i32, i32) {
    %c0_i32 = arith.constant 0 : i32
    %c0_i32_0 = arith.constant 0 : i32
    %c0_i32_1 = arith.constant 0 : i32
    return %c0_i32, %c0_i32_0 : i32, i32
  }
  func.func @transform_5(%arg0: i32, %arg1: i32) -> (i32, i32) {
    %c0_i32 = arith.constant 0 : i32
    %c0_i32_0 = arith.constant 0 : i32
    return %arg0, %c0_i32 : i32, i32
  }
  func.func @transform_6(%arg0: i32, %arg1: i32) -> (i32, i32) {
    %c0_i32 = arith.constant 0 : i32
    %c0_i32_0 = arith.constant 0 : i32
    return %arg0, %c0_i32 : i32, i32
  }
}

</mosaic_0001>

<bundles_post_ra>
// kernel: tpu_custom_call.1
= control target key start
LH: loop header
LB: loop body
LE: loop exit
PB: predicated region body
PF: predicated region fallthrough
CT: control target
= control target key end

     0   :  { %12 = vsyncpa [#allocation4], 0  ;;  %s622_s0 = inlined_call_operand.hbm [shape: f32[16,16], index: 0, kind: input, shape index: {}]   ;;  %s623_s1 = inlined_call_operand.hbm [shape: f32[16,32], index: 1, kind: input, shape index: {}]   ;;  %s624_s2 = inlined_call_operand.vmem [shape: f32[1,32], index: 2, kind: input, shape index: {}]   ;;  %s625_s3 = inlined_call_operand.hbm [shape: f32[32,32], index: 3, kind: input, shape index: {}]   ;;  %s626_s4 = inlined_call_operand.vmem [shape: f32[1,32], index: 4, kind: input, shape index: {}]   ;;  %s627_s5 = inlined_call_operand.hbm [shape: f32[16,32], index: 5, kind: output, shape index: {0}]   ;;  %s628_s6 = inlined_call_operand.hbm [shape: f32[16,32], index: 6, kind: output, shape index: {1}]  }
   0x1   :  { %13 = vsyncpa [#allocation7], 0 }
   0x2   :  { %14 = vsyncpa [#allocation5], 0 }
   0x3   :  { %15 = vsyncpa [#allocation11], 0  ;;  %s481_s21 = smov [#allocation6]   ;;  %s482_s23 = smov [#allocation3]  }
   0x4   :  { %s33_s22 = sshll.u32 %s481_s21, 4  ;;  %s21_s24 = sshll.u32 %s482_s23, 4  ;;  %s34_s22 = int_to_ptr.vmem [resolvable:$true] %s33_s22  ;;  %s524_s24 = int_to_ptr.vmem [resolvable:$true] %s21_s24 }
   0x5   :  { %s363_s27 = scalar_lea.hbm %s623_s1, 256 }
   0x6   :  { %p364_p0 = scmp.ne.s32.totalorder %s623_s1, %s363_s27  ;;  %p367_p1 = scmp.lt.u32.totalorder %s363_s27, %s623_s1 }
   0x8   :  { %p369_p2 = pnand %p367_p1, %p364_p0 }
   0xa   :  { %372 = shalt.err (!%p369_p2)
}
   0xb   :  { %s373_s8 = scalar_lea.vmem %s34_s22, 256  ;;  %p378_p4 = scmp.lt.s32.totalorder %s34_s22, %s34_s22 }
   0xc   :  { %p374_p3 = scmp.ne.s32.totalorder %s34_s22, %s373_s8  ;;  %p379_p5 = scmp.lt.s32.totalorder %s373_s8, %s373_s8 }
   0xe   :  { %p380_p6 = por %p379_p5, %p378_p4 }
  0x10   :  { %p381_p7 = pnand %p380_p6, %p374_p3 }
  0x12   :  { %384 = shalt.err (!%p381_p7)
}
  0x13   :  { %s483_s9 = smov 128   ;;  %s484_s10 = smov 8  }
  0x14   :  { %39 = dma.hbm_to_vmem [thread:$0]  %s623_s1, 256, %s34_s22, [#allocation7], %s483_s9, %s483_s9, %s484_s10  }
  0x15   :  { %s385_s15 = scalar_lea.hbm %s622_s0, 256 }
  0x16   :  { %p386_p8 = scmp.ne.s32.totalorder %s622_s0, %s385_s15  ;;  %p389_p9 = scmp.lt.u32.totalorder %s385_s15, %s622_s0 }
  0x18   :  { %p391_p10 = pnand %p389_p9, %p386_p8 }
  0x1a   :  { %394 = shalt.err (!%p391_p10)
}
  0x1b   :  { %s395_s20 = scalar_lea.vmem %s524_s24, 256  ;;  %p400_p12 = scmp.lt.s32.totalorder %s524_s24, %s524_s24 }
  0x1c   :  { %p396_p11 = scmp.ne.s32.totalorder %s524_s24, %s395_s20  ;;  %p401_p13 = scmp.lt.s32.totalorder %s395_s20, %s395_s20 }
  0x1e   :  { %p402_p0 = por %p401_p13, %p400_p12 }
  0x20   :  { %p403_p1 = pnand %p402_p0, %p396_p11 }
  0x22   :  { %406 = shalt.err (!%p403_p1)
}
  0x23   :  { %27 = dma.hbm_to_vmem [thread:$0]  %s622_s0, 256, %s524_s24, [#allocation4], %s483_s9, %s483_s9, %s484_s10  }
  0x24   :  { %s485_s22 = smov [#allocation8]   ;;  %s407_s27 = scalar_lea.hbm %s625_s3, 512 }
  0x25   :  { %s47_s23 = sshll.u32 %s485_s22, 4  ;;  %p408_p2 = scmp.ne.s32.totalorder %s625_s3, %s407_s27  ;;  %s48_s23 = int_to_ptr.vmem [resolvable:$true] %s47_s23 }
  0x26   :  { %p411_p3 = scmp.lt.u32.totalorder %s407_s27, %s625_s3 }
  0x28   :  { %p413_p4 = pnand %p411_p3, %p408_p2 }
  0x2a   :  { %416 = shalt.err (!%p413_p4)
}
  0x2b   :  { %s417_s8 = scalar_lea.vmem %s48_s23, 512  ;;  %p422_p6 = scmp.lt.s32.totalorder %s48_s23, %s48_s23 }
  0x2c   :  { %p418_p5 = scmp.ne.s32.totalorder %s48_s23, %s417_s8  ;;  %p423_p7 = scmp.lt.s32.totalorder %s417_s8, %s417_s8 }
  0x2e   :  { %p424_p8 = por %p423_p7, %p422_p6 }
  0x30   :  { %p425_p9 = pnand %p424_p8, %p418_p5 }
  0x32   :  { %428 = shalt.err (!%p425_p9)
}
  0x33   :  { %53 = dma.hbm_to_vmem [thread:$0]  %s625_s3, 512, %s48_s23, [#allocation7], %s483_s9, %s483_s9, %s484_s10  }
  0x34   :  { %473 = dma.done.wait [#allocation4], 256  }
  0x35   :  { %474 = vsyncadd [#allocation4], 4294967040 }
  0x36   :  { %475 = dma.done.wait [#allocation7], 768  }
  0x37   :  { %476 = vsyncadd [#allocation7], 4294966528  ;;  %vm69_vm0 = vcmask 261120   ;;  %v486_v0 = vmov 0.0   ;;  %vm78_vm1 = vcmask 130048   ;;  %v76_v1 = vld [vmem:[#allocation6] sm:$0xff] }
  0x38   :  { %71 = vst.msk [vmem:[#allocation2 + $0x8] sm:$0xff] %vm69_vm0, %v486_v0  ;;  %70 = vst.msk [vmem:[#allocation2] sm:$0xff] %vm69_vm0, %v486_v0  ;;  %v77_v2 = vld [vmem:[#allocation6 + $0x8] sm:$0xff]  ;;  %v74_v3 = vld [vmem:[#allocation3] sm:$0xff]  ;;  %s487_s12 = smov [#allocation9]  }
  0x39   :  { %v343_v4 = vpack.c.bf16 %v77_v2, %v76_v1  ;;  %329 = vmatprep.mubr.msk.f32.mxu0 %vm78_vm1, %v74_v3  ;;  %v75_v5 = vld [vmem:[#allocation3 + $0x8] sm:$0xff]  ;;  %v181_v6 = vld [vmem:[#allocation8] sm:$0xff]  ;;  %v183_v8 = vld [vmem:[#allocation8 + $0x10] sm:$0xff]  ;;  %s280_s13 = sshll.u32 %s487_s12, 4  ;;  %s281_s13 = int_to_ptr.vmem [resolvable:$true] %s280_s13 }
  0x3a   :  { %v182_v7 = vld [vmem:[#allocation8 + $0x8] sm:$0xff]  ;;  %v184_v10 = vld [vmem:[#allocation8 + $0x18] sm:$0xff]  ;;  %v311_v18 = vld [vmem:[%s624_s2] ss:$0 sm:$0xff]  ;;  %s429_s14 = scalar_lea.vmem %s281_s13, 256  ;;  %p434_p11 = scmp.lt.s32.totalorder %s281_s13, %s281_s13 }
  0x3b   :  { %344 = vmatprep.subr.bf16.mxu0 %v343_v4  ;;  %v347_v9 = vpack.c.bf16 %v182_v7, %v181_v6  ;;  %v351_v11 = vpack.c.bf16 %v184_v10, %v183_v8  ;;  %p430_p10 = scmp.ne.s32.totalorder %s281_s13, %s429_s14  ;;  %p435_p12 = scmp.lt.s32.totalorder %s429_s14, %s429_s14 }
  0x3c   :  { %346 = vmatpush3.bf16.msra.mxu0 %v343_v4 }
  0x3d   :  { %348 = vmatprep.subr.bf16.mxu1 %v347_v9  ;;  %p436_p13 = por %p435_p12, %p434_p11 }
  0x3e   :  { %350 = vmatpush3.bf16.msra.mxu1 %v347_v9 }
  0x3f   :  { %330 = vmatmul.mubr.msk.f32.vlgmr.msra.gmra.mrb[0].mxu0 %vm78_vm1, %v75_v5  ;;  %352 = vmatprep.subr.bf16.mxu1 %v351_v11  ;;  %v73_v12 = vld [vmem:[#allocation2 + $0x8] sm:$0xff]  ;;  %v72_v13 = vld [vmem:[#allocation2] sm:$0xff]  ;;  %p437_p0 = pnand %p436_p13, %p430_p10 }
  0x42   :  { %354 = vmatpush3.bf16.msra.mxu1 %v351_v11 }
 0x112   :  { %v331_v14 = vpop.f32.mrb[0].mxu0 }
 0x113   :  { %v161_v15 = vadd.f32 %v331_v14, %v73_v12  ;;  %v151_v16 = vpop.f32.mrb[1].mxu0 }
 0x114   :  { %v160_v17 = vadd.f32 %v151_v16, %v72_v13 }
 0x115   :  { %164 = vst.msk [vmem:[#allocation2 + $0x8] sm:$0xff] %vm69_vm0, %v161_v15 }
 0x116   :  { %163 = vst.msk [vmem:[#allocation2] sm:$0xff] %vm69_vm0, %v160_v17 }
 0x11c   :  { %v169_v19 = vld [vmem:[#allocation2 + $0x8] sm:$0xff] }
 0x11d   :  { %v168_v20 = vld [vmem:[#allocation2] sm:$0xff]  ;;  %v178_v21 = vadd.f32 %v311_v18, %v169_v19 }
 0x11e   :  { %v177_v22 = vadd.f32 %v311_v18, %v168_v20 }
 0x11f   :  { %180 = vst.msk [vmem:[#allocation9 + $0x8] sm:$0xff] %vm69_vm0, %v178_v21 }
 0x120   :  { %340 = vmatprep.mubr.msk.f32.mxu1 %vm69_vm0, %v177_v22  ;;  %179 = vst.msk [vmem:[#allocation9] sm:$0xff] %vm69_vm0, %v177_v22 }
 0x121   :  { %341 = vmatmul.mubr.msk.f32.vlgmr.msra.gmra.mrb[0].mxu1 %vm69_vm0, %v178_v21 }
 0x122   :  { %440 = shalt.err (!%p437_p0)
}
 0x123   :  { %s441_s16 = scalar_lea.hbm %s627_s5, 256 }
 0x124   :  { %p442_p1 = scmp.ne.s32.totalorder %s627_s5, %s441_s16  ;;  %p445_p2 = scmp.lt.u32.totalorder %s441_s16, %s627_s5 }
 0x126   :  { %p447_p3 = pnand %p445_p2, %p442_p1 }
 0x128   :  { %450 = shalt.err (!%p447_p3)
}
 0x129   :  { %286 = dma.vmem_to_hbm [thread:$0]  %s281_s13, 256, %s627_s5, [#allocation5], %s483_s9, %s483_s9, %s484_s10  }
 0x12a   :  { %v312_v23 = vld [vmem:[%s626_s4] ss:$0 sm:$0xff]  ;;  %s488_s25 = smov [#allocation10]  }
 0x12b   :  { %s292_s26 = sshll.u32 %s488_s25, 4  ;;  %s293_s26 = int_to_ptr.vmem [resolvable:$true] %s292_s26 }
 0x12c   :  { %s451_s27 = scalar_lea.vmem %s293_s26, 256  ;;  %p456_p5 = scmp.lt.s32.totalorder %s293_s26, %s293_s26 }
 0x12d   :  { %p452_p4 = scmp.ne.s32.totalorder %s293_s26, %s451_s27  ;;  %p457_p6 = scmp.lt.s32.totalorder %s451_s27, %s451_s27 }
 0x12f   :  { %p458_p7 = por %p457_p6, %p456_p5 }
 0x131   :  { %p459_p8 = pnand %p458_p7, %p452_p4 }
 0x1f4   :  { %v342_v24 = vpop.f32.mrb[0].mxu1 }
 0x1f5   :  { %v270_v25 = vadd.f32 %v342_v24, %v312_v23  ;;  %v264_v26 = vpop.f32.mrb[1].mxu1 }
 0x1f6   :  { %v265_v27 = vadd.f32 %v312_v23, %v264_v26 }
 0x1f7   :  { %274 = vst.msk [vmem:[#allocation10 + $0x8] sm:$0xff] %vm69_vm0, %v270_v25 }
 0x1f8   :  { %273 = vst.msk [vmem:[#allocation10] sm:$0xff] %vm69_vm0, %v265_v27 }
 0x1f9   :  { %462 = shalt.err (!%p459_p8)
}
 0x1fa   :  { %s463_s28 = scalar_lea.hbm %s628_s6, 256 }
 0x1fb   :  { %p464_p9 = scmp.ne.s32.totalorder %s628_s6, %s463_s28  ;;  %p467_p10 = scmp.lt.u32.totalorder %s463_s28, %s628_s6 }
 0x1fd   :  { %p469_p11 = pnand %p467_p10, %p464_p9 }
 0x1ff   :  { %472 = shalt.err (!%p469_p11)
}
 0x200   :  { %298 = dma.vmem_to_hbm [thread:$0]  %s293_s26, 256, %s628_s6, [#allocation11], %s483_s9, %s483_s9, %s484_s10  }
 0x201   :  { %477 = dma.done.wait [#allocation5], 256  }
 0x202   :  { %478 = vsyncadd [#allocation5], 4294967040 }
 0x203   :  { %479 = dma.done.wait [#allocation11], 256  }
 0x204   :  { %480 = vsyncadd [#allocation11], 4294967040 }
 0x205   :  { %305 = vsyncpa [#allocation4], 1 }
 0x206   :  { %306 = vsyncpa [#allocation7], 1 }
 0x207   :  { %307 = vsyncpa [#allocation5], 1 }
 0x208   :  { %308 = vsyncpa [#allocation11], 1 }

</bundles_post_ra>
